<compile_context>
chip_gen: v7x
topology: tpu7x:2x2x1
jax: 0.10.0
libtpu: 0.0.40
codegen_flags: <defaults>
</compile_context>

<pallas_src>
import jax
import jax.numpy as jnp
from jax import lax
from jax.experimental import pallas as pl
from jax.experimental.pallas import tpu as pltpu


def _round_up(a, b):
    return ((a + b - 1) // b) * b


def _make_seg_kernel(T, offs):
    """Build the kernel for lane-tile width T and static tap offsets `offs`.

    cur_ref : (1, T)   flat padded pixels of this tile
    halo_ref: (1, Sp)  flat padded pixels just past this tile (halo for taps)
    w1_ref  : (64, 9)  conv1 weights (Cout x tap)
    nb1_ref : (64, 1)  -b1 (folded-ReLU threshold)
    w2_ref  : (2, 64)  conv2 (1x1) weights
    fb_ref  : (2, 1)   fused bias = w2 @ b1 + b2
    o_ref   : (2, T)   output logits, lane-dense
    """
    def _seg_kernel(cur_ref, halo_ref, w1_ref, nb1_ref, w2_ref, fb_ref, o_ref):
        # In-kernel im2col: tap (dy,dx) of flat-padded pixel q is flat pixel
        # q + dy*Wp + dx, i.e. a static lane-offset slice of the stream.
        row = jnp.concatenate([cur_ref[...], halo_ref[...]], axis=1)            # (1, T+Sp)
        taps = jnp.concatenate([row[:, off:off + T] for off in offs], axis=0)   # (9, T)
        # conv1 (3x3, pad=1) as a single MXU matmul over the 9 taps.
        h = jnp.dot(w1_ref[...], taps, preferred_element_type=jnp.float32)      # (64, T)
        # Folded bias + ReLU: relu(h + b1) = max(h, -b1) + b1; the '+ b1' is
        # pre-absorbed into fb = w2 @ b1 + b2 (added once on the (2, T) output).
        h = jnp.maximum(h, nb1_ref[...])
        # conv2 (1x1) as a channel matmul on the MXU.
        out = jnp.dot(w2_ref[...], h, preferred_element_type=jnp.float32)       # (2, T)
        o_ref[...] = out + fb_ref[...]
    return _seg_kernel


def simple_seg_net_pallas(x_nchw, w1, b1, w2, b2):
    """x_nchw: (N,1,H,W) f32. w1: (64,1,3,3), b1: (64,), w2: (2,64,1,1), b2: (2,)."""
    N, Cin, H, W = x_nchw.shape
    assert Cin == 1
    Hp, Wp = H + 2, W + 2
    Q = N * Hp * Wp                       # flat padded pixel count

    # --- flat padded pixel stream: the ONLY image data the kernel reads -------
    x_pad = jnp.pad(x_nchw[:, 0, :, :].astype(jnp.float32), ((0, 0), (1, 1), (1, 1)))

    # --- tile selection --------------------------------------------------------
    Sp = _round_up(2 * Wp + 2, 128)       # halo width: max tap offset, lane-aligned
    T_CAP = 16384                         # (64,T) f32 hidden activation ~4 MiB -> ~8 MiB/step total
    if Q <= T_CAP:
        # Tiny input: one big step (no pipeline overhead on single-TC v5e/v6e).
        T = max(Sp, _round_up(Q, Sp))
        n_tiles = 1
    else:
        T = max(Sp, (T_CAP // Sp) * Sp)   # multiple of Sp so the halo block index is integral
        n_tiles = -(-Q // T)
        if n_tiles % 2:                   # even step count -> both v7x TensorCores get equal work
            n_tiles += 1
    halo_ratio = T // Sp
    L = (n_tiles + 1) * T                 # +1 zero tile backs the last tile's halo block
    xflat = jnp.pad(x_pad.reshape(-1), (0, L - Q)).reshape(1, L)

    # --- weights / folded biases (tiny, VMEM-resident) -------------------------
    w1r = w1[:, 0, :, :].reshape(64, 9).astype(jnp.float32)        # (64, 9)
    w2r = w2[:, :, 0, 0].astype(jnp.float32)                       # (2, 64)
    b1f = b1.astype(jnp.float32)
    nb1 = (-b1f).reshape(64, 1)                                    # (64, 1)
    fb = w2r @ b1f.reshape(64, 1) + b2.astype(jnp.float32).reshape(2, 1)  # (2, 1)

    offs = tuple(dy * Wp + dx for dy in range(3) for dx in range(3))

    out_flat = pl.pallas_call(
        _make_seg_kernel(T, offs),
        out_shape=jax.ShapeDtypeStruct((2, n_tiles * T), jnp.float32),
        grid_spec=pltpu.PrefetchScalarGridSpec(
            num_scalar_prefetch=0,
            grid=(n_tiles,),
            in_specs=[
                pl.BlockSpec((1, T), lambda i: (0, i)),                          # current tile
                pl.BlockSpec((1, Sp), lambda i: (0, (i + 1) * halo_ratio)),      # halo: start of next tile
                pl.BlockSpec((64, 9), lambda i: (0, 0)),
                pl.BlockSpec((64, 1), lambda i: (0, 0)),
                pl.BlockSpec((2, 64), lambda i: (0, 0)),
                pl.BlockSpec((2, 1), lambda i: (0, 0)),
            ],
            out_specs=pl.BlockSpec((2, T), lambda i: (0, i)),
        ),
        compiler_params=pltpu.CompilerParams(
            dimension_semantics=("parallel",),
            vmem_limit_bytes=32 * 1024 * 1024),
    )(xflat, xflat, w1r, nb1, w2r, fb)

    # Drop garbage lanes (pad ring / seam positions) and restore NCHW.
    logits = out_flat[:, :Q].reshape(2, N, Hp, Wp)[:, :, :H, :W]
    return jnp.transpose(logits, (1, 0, 2, 3))


def _reference(x_nchw, w1, b1, w2, b2):
    """Pure-JAX reference using lax conv (NCHW, OIHW)."""
    dn = lax.conv_dimension_numbers(x_nchw.shape, w1.shape, ("NCHW", "OIHW", "NCHW"))
    h = lax.conv_general_dilated(x_nchw, w1, window_strides=(1, 1),
                                 padding=((1, 1), (1, 1)), dimension_numbers=dn)
    h = h + b1.reshape(1, 64, 1, 1)
    h = jnp.maximum(h, 0.0)
    dn2 = lax.conv_dimension_numbers(h.shape, w2.shape, ("NCHW", "OIHW", "NCHW"))
    o = lax.conv_general_dilated(h, w2, window_strides=(1, 1),
                                 padding=((0, 0), (0, 0)), dimension_numbers=dn2)
    return o + b2.reshape(1, 2, 1, 1)


if __name__ == "__main__":
    key = jax.random.PRNGKey(0)
    k_x, k_w1, k_b1, k_w2, k_b2 = jax.random.split(key, 5)

    # Small shapes consistent with the module: N=2, Cin=1, H=W=16.
    N, H, W = 2, 16, 16
    x = jax.random.normal(k_x, (N, 1, H, W), dtype=jnp.float32)

    # Deterministic parameters (PyTorch shapes): conv1 (64,1,3,3)+(64,), conv2 (2,64,1,1)+(2,)
    w1 = jax.random.normal(k_w1, (64, 1, 3, 3), dtype=jnp.float32) * 0.1
    b1 = jax.random.normal(k_b1, (64,), dtype=jnp.float32) * 0.1
    w2 = jax.random.normal(k_w2, (2, 64, 1, 1), dtype=jnp.float32) * 0.1
    b2 = jax.random.normal(k_b2, (2,), dtype=jnp.float32) * 0.1

    out = simple_seg_net_pallas(x, w1, b1, w2, b2)
    out = jax.block_until_ready(out)

    ref = _reference(x, w1, b1, w2, b2)
    assert out.shape == (N, 2, H, W), out.shape
    assert jnp.allclose(out, ref, atol=1e-4, rtol=1e-4), float(jnp.max(jnp.abs(out - ref)))

    print("KERNEL_OK")
</pallas_src>

<mosaic_0001>
module attributes {stable_mosaic.version = 11 : i64} {
  func.func @_seg_kernel(%arg0: i32, %arg1: memref<1x768xf32, #tpu.memory_space<vmem>>, %arg2: memref<1x128xf32, #tpu.memory_space<vmem>>, %arg3: memref<64x9xf32, #tpu.memory_space<vmem>>, %arg4: memref<64x1xf32, #tpu.memory_space<vmem>>, %arg5: memref<2x64xf32, #tpu.memory_space<vmem>>, %arg6: memref<2x1xf32, #tpu.memory_space<vmem>>, %arg7: memref<2x768xf32, #tpu.memory_space<vmem>>) attributes {dimension_semantics = [#tpu.dimension_semantics<parallel>], iteration_bounds = array<i64: 1>, scalar_prefetch = 0 : i64, scratch_operands = 0 : i64, tpu.core_type = #tpu.core_type<tc>, window_params = [{transform_indices = @transform_0, window_bounds = array<i64: 1, 768>}, {transform_indices = @transform_1, window_bounds = array<i64: 1, 128>}, {pipeline_mode = #tpu.pipeline_mode<synchronous>, transform_indices = @transform_2, window_bounds = array<i64: 64, 9>}, {pipeline_mode = #tpu.pipeline_mode<synchronous>, transform_indices = @transform_3, window_bounds = array<i64: 64, 1>}, {pipeline_mode = #tpu.pipeline_mode<synchronous>, transform_indices = @transform_4, window_bounds = array<i64: 2, 64>}, {pipeline_mode = #tpu.pipeline_mode<synchronous>, transform_indices = @transform_5, window_bounds = array<i64: 2, 1>}, {transform_indices = @transform_6, window_bounds = array<i64: 2, 768>}]} {
    %c0 = arith.constant 0 : index
    %c0_0 = arith.constant 0 : index
    %0 = vector.load %arg1[%c0, %c0_0] : memref<1x768xf32, #tpu.memory_space<vmem>>, vector<1x768xf32>
    %c0_1 = arith.constant 0 : index
    %c0_2 = arith.constant 0 : index
    %1 = vector.load %arg2[%c0_1, %c0_2] : memref<1x128xf32, #tpu.memory_space<vmem>>, vector<1x128xf32>
    %2 = tpu.concatenate %0, %1 in 1 : vector<1x768xf32>, vector<1x128xf32> -> vector<1x896xf32>
    %3 = vector.extract_strided_slice %2 {offsets = [0, 0], sizes = [1, 768], strides = [1, 1]} : vector<1x896xf32> to vector<1x768xf32>
    %4 = vector.extract_strided_slice %2 {offsets = [0, 1], sizes = [1, 768], strides = [1, 1]} : vector<1x896xf32> to vector<1x768xf32>
    %5 = vector.extract_strided_slice %2 {offsets = [0, 2], sizes = [1, 768], strides = [1, 1]} : vector<1x896xf32> to vector<1x768xf32>
    %6 = vector.extract_strided_slice %2 {offsets = [0, 18], sizes = [1, 768], strides = [1, 1]} : vector<1x896xf32> to vector<1x768xf32>
    %7 = vector.extract_strided_slice %2 {offsets = [0, 19], sizes = [1, 768], strides = [1, 1]} : vector<1x896xf32> to vector<1x768xf32>
    %8 = vector.extract_strided_slice %2 {offsets = [0, 20], sizes = [1, 768], strides = [1, 1]} : vector<1x896xf32> to vector<1x768xf32>
    %9 = vector.extract_strided_slice %2 {offsets = [0, 36], sizes = [1, 768], strides = [1, 1]} : vector<1x896xf32> to vector<1x768xf32>
    %10 = vector.extract_strided_slice %2 {offsets = [0, 37], sizes = [1, 768], strides = [1, 1]} : vector<1x896xf32> to vector<1x768xf32>
    %11 = vector.extract_strided_slice %2 {offsets = [0, 38], sizes = [1, 768], strides = [1, 1]} : vector<1x896xf32> to vector<1x768xf32>
    %12 = tpu.concatenate %3, %4, %5, %6, %7, %8, %9, %10, %11 in 0 : vector<1x768xf32>, vector<1x768xf32>, vector<1x768xf32>, vector<1x768xf32>, vector<1x768xf32>, vector<1x768xf32>, vector<1x768xf32>, vector<1x768xf32>, vector<1x768xf32> -> vector<9x768xf32>
    %c0_3 = arith.constant 0 : index
    %c0_4 = arith.constant 0 : index
    %13 = vector.load %arg3[%c0_3, %c0_4] : memref<64x9xf32, #tpu.memory_space<vmem>>, vector<64x9xf32>
    %cst = arith.constant dense<0.000000e+00> : vector<64x768xf32>
    %14 = tpu.matmul %13, %12, %cst {dimension_numbers = #tpu.dot_dimension_numbers<[1], [0], [0], [1], [0, 0, 1, 1], [], []>} : vector<64x9xf32>, vector<9x768xf32>, vector<64x768xf32> -> vector<64x768xf32>
    %c0_5 = arith.constant 0 : index
    %c0_6 = arith.constant 0 : index
    %15 = vector.load %arg4[%c0_5, %c0_6] : memref<64x1xf32, #tpu.memory_space<vmem>>, vector<64x1xf32>
    %16 = vector.broadcast %15 : vector<64x1xf32> to vector<64x768xf32>
    %17 = arith.maximumf %14, %16 : vector<64x768xf32>
    %c0_7 = arith.constant 0 : index
    %c0_8 = arith.constant 0 : index
    %18 = vector.load %arg5[%c0_7, %c0_8] : memref<2x64xf32, #tpu.memory_space<vmem>>, vector<2x64xf32>
    %cst_9 = arith.constant dense<0.000000e+00> : vector<2x768xf32>
    %19 = tpu.matmul %18, %17, %cst_9 {dimension_numbers = #tpu.dot_dimension_numbers<[1], [0], [0], [1], [0, 0, 1, 1], [], []>} : vector<2x64xf32>, vector<64x768xf32>, vector<2x768xf32> -> vector<2x768xf32>
    %c0_10 = arith.constant 0 : index
    %c0_11 = arith.constant 0 : index
    %20 = vector.load %arg6[%c0_10, %c0_11] : memref<2x1xf32, #tpu.memory_space<vmem>>, vector<2x1xf32>
    %21 = vector.broadcast %20 : vector<2x1xf32> to vector<2x768xf32>
    %22 = arith.addf %19, %21 : vector<2x768xf32>
    %c0_12 = arith.constant 0 : index
    %c0_13 = arith.constant 0 : index
    %23 = vector.load %arg7[%c0_12, %c0_13] : memref<2x768xf32, #tpu.memory_space<vmem>>, vector<2x768xf32>
    tpu.vector_store %arg7[%c0_12, %c0_13], %22 {strides = array<i32>} : memref<2x768xf32, #tpu.memory_space<vmem>>, vector<2x768xf32>,
    return
  }
  func.func @transform_0(%arg0: i32) -> (i32, i32) {
    %c0_i32 = arith.constant 0 : i32
    %c0_i32_0 = arith.constant 0 : i32
    return %c0_i32, %arg0 : i32, i32
  }
  func.func @transform_1(%arg0: i32) -> (i32, i32) {
    %c1_i32 = arith.constant 1 : i32
    %0 = arith.addi %arg0, %c1_i32 : i32
    %c6_i32 = arith.constant 6 : i32
    %1 = arith.muli %0, %c6_i32 : i32
    %c0_i32 = arith.constant 0 : i32
    %c0_i32_0 = arith.constant 0 : i32
    return %c0_i32, %1 : i32, i32
  }
  func.func @transform_2(%arg0: i32) -> (i32, i32) {
    %c0_i32 = arith.constant 0 : i32
    %c0_i32_0 = arith.constant 0 : i32
    %c0_i32_1 = arith.constant 0 : i32
    return %c0_i32, %c0_i32_0 : i32, i32
  }
  func.func @transform_3(%arg0: i32) -> (i32, i32) {
    %c0_i32 = arith.constant 0 : i32
    %c0_i32_0 = arith.constant 0 : i32
    %c0_i32_1 = arith.constant 0 : i32
    return %c0_i32, %c0_i32_0 : i32, i32
  }
  func.func @transform_4(%arg0: i32) -> (i32, i32) {
    %c0_i32 = arith.constant 0 : i32
    %c0_i32_0 = arith.constant 0 : i32
    %c0_i32_1 = arith.constant 0 : i32
    return %c0_i32, %c0_i32_0 : i32, i32
  }
  func.func @transform_5(%arg0: i32) -> (i32, i32) {
    %c0_i32 = arith.constant 0 : i32
    %c0_i32_0 = arith.constant 0 : i32
    %c0_i32_1 = arith.constant 0 : i32
    return %c0_i32, %c0_i32_0 : i32, i32
  }
  func.func @transform_6(%arg0: i32) -> (i32, i32) {
    %c0_i32 = arith.constant 0 : i32
    %c0_i32_0 = arith.constant 0 : i32
    return %c0_i32, %arg0 : i32, i32
  }
}

</mosaic_0001>

<bundles_post_ra>
// kernel: tpu_custom_call.1
= control target key start
LH: loop header
LB: loop body
LE: loop exit
PB: predicated region body
PF: predicated region fallthrough
CT: control target
= control target key end

     0   :  { %v46_v0 = vlaneseq  ;;  %s2043_s0 = inlined_call_operand.vmem [shape: f32[1,1536], index: 0, kind: input, shape index: {}]   ;;  %s2044_s1 = inlined_call_operand.vmem [shape: f32[1,1536], index: 1, kind: input, shape index: {}]   ;;  %s2045_s2 = inlined_call_operand.vmem [shape: f32[64,9], index: 2, kind: input, shape index: {}]   ;;  %s2046_s3 = inlined_call_operand.vmem [shape: f32[64,1], index: 3, kind: input, shape index: {}]   ;;  %s2047_s4 = inlined_call_operand.vmem [shape: f32[2,64], index: 4, kind: input, shape index: {}]   ;;  %s2048_s5 = inlined_call_operand.vmem [shape: f32[2,1], index: 5, kind: input, shape index: {}]   ;;  %s2049_s6 = inlined_call_operand.hbm [shape: f32[2,768], index: 6, kind: output, shape index: {}]  }
   0x1   :  { %v1476_v2 = vld [vmem:[%s2043_s0] sm:$0x3f] }
   0x2   :  { %v1471_v1 = vshrl.u32 %v46_v0, 7 }
   0x4   :  { %v52_v3 = vsub.s32 1, %v1471_v1  ;;  %v56_v4 = vsub.s32 2, %v1471_v1  ;;  %v48_v5 = vsub.s32 0, %v1471_v1  ;;  %v60_v6 = vsub.s32 3, %v1471_v1 }
   0x5   :  { %11 = vsyncpa [#allocation3], 0  ;;  %s1423_s0 = smov 126   ;;  %s1424_s23 = smov 127   ;;  %v64_v47 = vsub.s32 4, %v1471_v1  ;;  %v68_v48 = vsub.s32 5, %v1471_v1 }
   0x6   :  { %v1483_v7 = vrot.slane %v1476_v2, %v52_v3  ;;  %v1486_v8 = vrot.slane %v1476_v2, %v56_v4  ;;  %v1489_v9 = vrot.slane %v1476_v2, %v48_v5  ;;  %v1492_v10 = vrot.slane %v1476_v2, %v60_v6  ;;  %s1425_s24 = smov 110   ;;  %s1426_s25 = smov 109  }
   0x7   :  { %s1427_s26 = smov 108   ;;  %v1535_v53 = vrot.slane %v1476_v2, %v64_v47  ;;  %v1538_v54 = vrot.slane %v1476_v2, %v68_v48  ;;  %s1428_s27 = smov 92   ;;  %v1430_v62 = vmov 0.0   ;;  %vm132_vm0 = vcmask 1031168  }
   0x8   :  { %v112_v11 = vrot.slane %v1483_v7, 6  ;;  %v113_v12 = vrot.slane %v1486_v8, 6  ;;  %v78_v13 = vrot.slane %v1483_v7, 7  ;;  %v79_v14 = vrot.slane %v1486_v8, 7  ;;  %s1429_s28 = smov 91   ;;  %494 = vmatprep.mubr.f32.mxu0 %v1430_v62  ;;  %530 = vmatprep.mubr.f32.mxu1 %v1430_v62  ;;  %s1431_s29 = smov 90  }
   0x9   :  { %v111_v15 = vrot.slane %v1489_v9, 6  ;;  %v114_v16 = vrot.slane %v1492_v10, 6  ;;  %v77_v17 = vrot.slane %v1489_v9, 7  ;;  %v80_v18 = vrot.slane %v1492_v10, 7 }
   0xa   :  { %v1267_v19 = vpack.i.bf16 %v113_v12, %v112_v11  ;;  %v1257_v20 = vpack.i.bf16 %v79_v14, %v78_v13  ;;  %v145_v21 = vrot.slane %v1489_v9, 5  ;;  %v148_v22 = vrot.slane %v1492_v10, 5  ;;  %v1141_v14 = vld [vmem:[%s2044_s1 + $0x6] sm:$0x1] }
   0xb   :  { %v1272_v23 = vpack.i.bf16 %v114_v16, %v111_v15  ;;  %v1262_v24 = vpack.i.bf16 %v80_v18, %v77_v17  ;;  %v146_v25 = vrot.slane %v1483_v7, 5  ;;  %v147_v26 = vrot.slane %v1486_v8, 5 }
   0xc   :  { %1268 = vrot.lane.b32.xlu1 %v1267_v19, %s1423_s0  ;;  %1258 = vrot.lane.b32.xlu0 %v1257_v20, %s1424_s23  ;;  %v1282_v27 = vpack.i.bf16 %v148_v22, %v145_v21  ;;  %v179_v28 = vrot.slane %v1489_v9, 4  ;;  %v182_v30 = vrot.slane %v1492_v10, 4  ;;  %v180_v31 = vrot.slane %v1483_v7, 4 }
   0xd   :  { %v1277_v29 = vpack.i.bf16 %v147_v26, %v146_v25  ;;  %v181_v32 = vrot.slane %v1486_v8, 4  ;;  %v213_v33 = vrot.slane %v1489_v9, 3  ;;  %v216_v34 = vrot.slane %v1492_v10, 3 }
   0xe   :  { %v1292_v35 = vpack.i.bf16 %v182_v30, %v179_v28  ;;  %v214_v37 = vrot.slane %v1483_v7, 3  ;;  %v215_v38 = vrot.slane %v1486_v8, 3  ;;  %v247_v40 = vrot.slane %v1489_v9, 2 }
   0xf   :  { %v1287_v36 = vpack.i.bf16 %v181_v32, %v180_v31  ;;  %v1302_v39 = vpack.i.bf16 %v216_v34, %v213_v33  ;;  %v250_v42 = vrot.slane %v1492_v10, 2  ;;  %v248_v43 = vrot.slane %v1483_v7, 2  ;;  %v769_v31 = vld [vmem:[%s2046_s3] sm:$0xff]  ;;  %v770_v32 = vld [vmem:[%s2046_s3 + $0x8] sm:$0xff]  ;;  %v771_v33 = vld [vmem:[%s2046_s3 + $0x10] sm:$0xff] }
  0x10   :  { %1273 = vrot.lane.b32.xlu1 %v1272_v23, %s1423_s0  ;;  %1263 = vrot.lane.b32.xlu0 %v1262_v24, %s1424_s23  ;;  %v1297_v41 = vpack.i.bf16 %v215_v38, %v214_v37  ;;  %v249_v44 = vrot.slane %v1486_v8, 2  ;;  %v281_v45 = vrot.slane %v1489_v9, 1  ;;  %v284_v46 = vrot.slane %v1492_v10, 1  ;;  %v773_v37 = vld [vmem:[%s2046_s3 + $0x20] sm:$0xff]  ;;  %v774_v38 = vld [vmem:[%s2046_s3 + $0x28] sm:$0xff] }
  0x11   :  { %v1312_v49 = vpack.i.bf16 %v250_v42, %v247_v40  ;;  %v282_v51 = vrot.slane %v1483_v7, 1  ;;  %v283_v52 = vrot.slane %v1486_v8, 1  ;;  %v115_v57 = vrot.slane %v1535_v53, 6  ;;  %v775_v40 = vld [vmem:[%s2046_s3 + $0x30] sm:$0xff] }
  0x12   :  { %v1307_v50 = vpack.i.bf16 %v249_v44, %v248_v43  ;;  %v1322_v55 = vpack.i.bf16 %v284_v46, %v281_v45  ;;  %v116_v58 = vrot.slane %v1538_v54, 6  ;;  %v1327_v59 = vpack.i.bf16 %v1486_v8, %v1483_v7  ;;  %v866_v44 = vld [vmem:[%s2048_s5] sm:$0x3] }
  0x13   :  { %v1317_v56 = vpack.i.bf16 %v283_v52, %v282_v51  ;;  %v81_v60 = vrot.slane %v1535_v53, 7  ;;  %v82_v61 = vrot.slane %v1538_v54, 7  ;;  %v183_v0 = vrot.slane %v1535_v53, 4 }
  0x14   :  { %1283 = vrot.lane.b32.xlu1 %v1282_v27, %s1425_s24  ;;  %1278 = vrot.lane.b32.xlu0 %v1277_v29, %s1425_s24  ;;  %v1337_v63 = vpack.i.bf16 %v116_v58, %v115_v57  ;;  %v184_v3 = vrot.slane %v1538_v54, 4  ;;  %v149_v4 = vrot.slane %v1535_v53, 5  ;;  %v150_v5 = vrot.slane %v1538_v54, 5 }
  0x15   :  { %v1332_v2 = vpack.i.bf16 %v82_v61, %v81_v60  ;;  %v217_v12 = vrot.slane %v1535_v53, 3  ;;  %v218_v13 = vrot.slane %v1538_v54, 3  ;;  %v83_v16 = vrot.slane %v1141_v14, 7 }
  0x16   :  { %v1347_v6 = vpack.i.bf16 %v184_v3, %v183_v0  ;;  %v1342_v11 = vpack.i.bf16 %v150_v5, %v149_v4  ;;  %v251_v17 = vrot.slane %v1535_v53, 2  ;;  %v252_v18 = vrot.slane %v1538_v54, 2 }
  0x17   :  { %v1352_v15 = vpack.i.bf16 %v218_v13, %v217_v12  ;;  %v117_v20 = vrot.slane %v1141_v14, 6  ;;  %v285_v21 = vrot.slane %v1535_v53, 1  ;;  %v286_v22 = vrot.slane %v1538_v54, 1 }
  0x18   :  { %1293 = vrot.lane.b32.xlu1 %v1292_v35, %s1426_s25  ;;  %1288 = vrot.lane.b32.xlu0 %v1287_v36, %s1426_s25  ;;  %v1357_v19 = vpack.i.bf16 %v252_v18, %v251_v17  ;;  %v151_v24 = vrot.slane %v1141_v14, 5  ;;  %v1367_v25 = vpack.i.bf16 %v1535_v53, %v1492_v10  ;;  %v185_v26 = vrot.slane %v1141_v14, 4  ;;  %v772_v36 = vld [vmem:[%s2046_s3 + $0x18] sm:$0xff] }
  0x19   :  { %v1362_v23 = vpack.i.bf16 %v286_v22, %v285_v21  ;;  %v253_v27 = vrot.slane %v1141_v14, 2  ;;  %v219_v28 = vrot.slane %v1141_v14, 3  ;;  %v1372_v29 = vpack.i.bf16 %v1141_v14, %v1538_v54 }
  0x1a   :  { %v287_v30 = vrot.slane %v1141_v14, 1  ;;  %v1432_v34 = vmov 0   ;;  %v1378_v35 = vpack.i.bf16 %v770_v32, %v769_v31  ;;  %v1389_v43 = vpack.i.bf16 %v774_v38, %v773_v37 }
  0x1b   :  { %1377 = vset.pattern.permute.xlu0 %v1432_v34  ;;  %1383 = vset.pattern.permute.xlu1 %v1432_v34  ;;  %vm98_vm1 = vcmask 1039360   ;;  %vm336_vm2 = vcmask 1040384   ;;  %vm166_vm3 = vcmask 900096   ;;  %vm343_vm4 = vcmask 1041408  }
  0x1c   :  { %1303 = vrot.lane.b32.xlu1 %v1302_v39, %s1427_s26  ;;  %1298 = vrot.lane.b32.xlu0 %v1297_v41, %s1427_s26  ;;  %v1384_v39 = vpack.i.bf16 %v772_v36, %v771_v33  ;;  %v776_v41 = vld [vmem:[%s2046_s3 + $0x38] sm:$0xff]  ;;  %vm350_vm5 = vcmask 1042432   ;;  %vm200_vm6 = vcmask 891904   ;;  %vm357_vm7 = vcmask 1043456  }
  0x1d   :  { %v1394_v42 = vpack.i.bf16 %v776_v41, %v775_v40  ;;  %vm234_vm8 = vcmask 883712   ;;  %vm364_vm9 = vcmask 1044480   ;;  %vm268_vm10 = vcmask 752640  }
  0x1e   :  { %vm371_vm11 = vcmask 1045504   ;;  %vm2050_vm12 = vcmask 744448   ;;  %vm378_vm13 = vcmask 1046528   ;;  %vm2051_vm14 = vcmask 736256  }
  0x1f   :  { %vm1433_vm15 = vmmov 1  }
  0x20   :  { %1313 = vrot.lane.b32.xlu1 %v1312_v49, %s1428_s27  ;;  %1308 = vrot.lane.b32.xlu0 %v1307_v50, %s1428_s27 }
  0x24   :  { %1323 = vrot.lane.b32.xlu1 %v1322_v55, %s1429_s28  ;;  %1318 = vrot.lane.b32.xlu0 %v1317_v56, %s1429_s28 }
  0x28   :  { %315 = vrot.lane.b32.xlu1 %v1489_v9, %s1431_s29  ;;  %1328 = vrot.lane.b32.xlu0 %v1327_v59, %s1431_s29 }
  0x2c   :  { %1338 = vrot.lane.b32.xlu1 %v1337_v63, %s1423_s0  ;;  %1333 = vrot.lane.b32.xlu0 %v1332_v2, %s1424_s23 }
  0x30   :  { %1348 = vrot.lane.b32.xlu1 %v1347_v6, %s1426_s25  ;;  %1343 = vrot.lane.b32.xlu0 %v1342_v11, %s1425_s24 }
  0x34   :  { %1353 = vrot.lane.b32.xlu1 %v1352_v15, %s1427_s26  ;;  %96 = vrot.lane.b32.xlu0 %v83_v16, %s1424_s23 }
  0x38   :  { %1358 = vrot.lane.b32.xlu1 %v1357_v19, %s1428_s27  ;;  %130 = vrot.lane.b32.xlu0 %v117_v20, %s1423_s0 }
  0x3c   :  { %1363 = vrot.lane.b32.xlu1 %v1362_v23, %s1429_s28  ;;  %164 = vrot.lane.b32.xlu0 %v151_v24, %s1425_s24 }
  0x40   :  { %1368 = vrot.lane.b32.xlu1 %v1367_v25, %s1431_s29  ;;  %198 = vrot.lane.b32.xlu0 %v185_v26, %s1426_s25 }
  0x44   :  { %266 = vrot.lane.b32.xlu1 %v253_v27, %s1428_s27  ;;  %232 = vrot.lane.b32.xlu0 %v219_v28, %s1427_s26 }
  0x48   :  { %1373 = vrot.lane.b32.xlu1 %v1372_v29, %s1431_s29  ;;  %300 = vrot.lane.b32.xlu0 %v287_v30, %s1429_s28 }
  0x4c   :  { %1379 = vperm.xlu0 %1377, %v1378_v35   ;;  %1385 = vperm.xlu1 %1383, %v1384_v39  }
  0x50   :  { %1395 = vperm.xlu0 %1377, %v1394_v42   ;;  %1390 = vperm.xlu1 %1383, %v1389_v43  }
  0x54   :  { %869 = vperm.xlu1 %1383, %v866_v44  }
  0x7e   :  { %v1614_v45 = vpop.permute.xlu1 %1268  ;;  %v1616_v46 = vpop.permute.xlu0 %1258 }
  0x7f   :  { %v1261_v55 = vunpack.i.h.bf16 %v1616_v46  ;;  %v1260_v56 = vunpack.i.l.bf16 %v1616_v46  ;;  %v1271_v60 = vunpack.i.h.bf16 %v1614_v45  ;;  %v1270_v61 = vunpack.i.l.bf16 %v1614_v45 }
  0x81   :  { %v100_v63 = vsel %vm98_vm1, %v1260_v56, %v1261_v55  ;;  %v134_v14 = vsel %vm132_vm0, %v1270_v61, %v1271_v60 }
  0x82   :  { %v1618_v47 = vpop.permute.xlu1 %1273  ;;  %v1620_v48 = vpop.permute.xlu0 %1263  ;;  %v338_v15 = vsel %vm336_vm2, %v1483_v7, %v100_v63 }
  0x83   :  { %v1265_v57 = vunpack.i.l.bf16 %v1620_v48  ;;  %v1275_v0 = vunpack.i.l.bf16 %v1618_v47  ;;  %v345_v32 = vsel %vm343_vm4, %v338_v15, %v134_v14 }
  0x85   :  { %v99_v2 = vsel %vm98_vm1, %v1265_v57, %v1260_v56  ;;  %v133_v17 = vsel %vm132_vm0, %v1275_v0, %v1270_v61 }
  0x86   :  { %v1622_v49 = vpop.permute.xlu1 %1283  ;;  %v1624_v50 = vpop.permute.xlu0 %1278  ;;  %v337_v21 = vsel %vm336_vm2, %v1489_v9, %v99_v2  ;;  %v1266_v2 = vunpack.i.h.bf16 %v1620_v48 }
  0x87   :  { %v1285_v3 = vunpack.i.l.bf16 %v1622_v49  ;;  %v1281_v4 = vunpack.i.h.bf16 %v1624_v50  ;;  %v1280_v5 = vunpack.i.l.bf16 %v1624_v50  ;;  %v344_v33 = vsel %vm343_vm4, %v337_v21, %v133_v17 }
  0x89   :  { %v167_v24 = vsel %vm166_vm3, %v1285_v3, %v1280_v5  ;;  %v168_v25 = vsel %vm166_vm3, %v1280_v5, %v1281_v4 }
  0x8a   :  { %v1626_v51 = vpop.permute.xlu1 %1293  ;;  %v1628_v52 = vpop.permute.xlu0 %1288  ;;  %v351_v36 = vsel %vm350_vm5, %v344_v33, %v167_v24  ;;  %v352_v37 = vsel %vm350_vm5, %v345_v32, %v168_v25  ;;  %v1738_v24 = vld [vmem:[%s2045_s2] sm:$0xff] }
  0x8b   :  { %v1295_v6 = vunpack.i.l.bf16 %v1626_v51  ;;  %v1290_v11 = vunpack.i.l.bf16 %v1628_v52  ;;  %v1291_v16 = vunpack.i.h.bf16 %v1628_v52  ;;  %v1296_v46 = vunpack.i.h.bf16 %v1626_v51  ;;  %v1765_v51 = vld [vmem:[%s2045_s2 + $0x8] sm:$0xff] }
  0x8d   :  { %v201_v26 = vsel %vm200_vm6, %v1295_v6, %v1290_v11  ;;  %v202_v9 = vsel %vm200_vm6, %v1290_v11, %v1291_v16  ;;  %v203_v33 = vsel %vm200_vm6, %v1291_v16, %v1296_v46 }
  0x8e   :  { %v1633_v58 = vpop.permute.xlu1 %1303  ;;  %v1635_v59 = vpop.permute.xlu0 %1298  ;;  %v358_v40 = vsel %vm357_vm7, %v351_v36, %v201_v26  ;;  %v359_v41 = vsel %vm357_vm7, %v352_v37, %v202_v9 }
  0x8f   :  { %v1305_v18 = vunpack.i.l.bf16 %v1633_v58  ;;  %v1301_v19 = vunpack.i.h.bf16 %v1635_v59  ;;  %v1300_v20 = vunpack.i.l.bf16 %v1635_v59 }
  0x91   :  { %v235_v34 = vsel %vm234_vm8, %v1305_v18, %v1300_v20  ;;  %v236_v35 = vsel %vm234_vm8, %v1300_v20, %v1301_v19 }
  0x92   :  { %v1649_v12 = vpop.permute.xlu1 %1313  ;;  %v1651_v13 = vpop.permute.xlu0 %1308  ;;  %v365_v57 = vsel %vm364_vm9, %v358_v40, %v235_v34  ;;  %v366_v0 = vsel %vm364_vm9, %v359_v41, %v236_v35  ;;  %v1306_v34 = vunpack.i.h.bf16 %v1633_v58 }
  0x93   :  { %v1315_v22 = vunpack.i.l.bf16 %v1649_v12  ;;  %v1311_v23 = vunpack.i.h.bf16 %v1651_v13  ;;  %v1310_v7 = vunpack.i.l.bf16 %v1651_v13  ;;  %v1316_v35 = vunpack.i.h.bf16 %v1649_v12 }
  0x95   :  { %v269_v38 = vsel %vm268_vm10, %v1315_v22, %v1310_v7  ;;  %v270_v39 = vsel %vm268_vm10, %v1310_v7, %v1311_v23  ;;  %v1276_v22 = vunpack.i.h.bf16 %v1618_v47  ;;  %v101_v7 = vsel %vm98_vm1, %v1261_v55, %v1266_v2  ;;  %v1751_v55 = vld [vmem:[%s2045_s2 + $0x30] sm:$0xff] }
  0x96   :  { %v1673_v27 = vpop.permute.xlu1 %1323  ;;  %v1675_v28 = vpop.permute.xlu0 %1318  ;;  %v373_v3 = vsel %vm371_vm11, %v366_v0, %v270_v39  ;;  %v372_v5 = vsel %vm371_vm11, %v365_v57, %v269_v38  ;;  %v1286_v47 = vunpack.i.h.bf16 %v1622_v49  ;;  %v339_v49 = vsel %vm336_vm2, %v1486_v8, %v101_v7  ;;  %v1799_v38 = vld [vmem:[%s2045_s2 + $0x10] sm:$0xff] }
  0x97   :  { %v1325_v29 = vunpack.i.l.bf16 %v1673_v27  ;;  %v1321_v30 = vunpack.i.h.bf16 %v1675_v28  ;;  %v1320_v31 = vunpack.i.l.bf16 %v1675_v28  ;;  %v135_v9 = vsel %vm132_vm0, %v1271_v60, %v1276_v22  ;;  %v1835_v28 = vld [vmem:[%s2045_s2 + $0x18] sm:$0xff] }
  0x98   :  { %v169_v45 = vsel %vm166_vm3, %v1281_v4, %v1286_v47  ;;  %v346_v32 = vsel %vm343_vm4, %v339_v49, %v135_v9  ;;  %v1785_v4 = vld [vmem:[%s2045_s2 + $0x38] sm:$0xff]  ;;  %v1326_v36 = vunpack.i.h.bf16 %v1673_v27 }
  0x99   :  { %v303_v42 = vsel %vm2050_vm12, %v1325_v29, %v1320_v31  ;;  %v304_v56 = vsel %vm2050_vm12, %v1320_v31, %v1321_v30  ;;  %vm1715_vm12 = vmpackc.low %vm336_vm2, %vm1433_vm15  ;;  %vm393_vm15 = vcmask 72704   ;;  %v353_v58 = vsel %vm350_vm5, %v346_v32, %v169_v45 }
  0x9a   :  { %v316_v43 = vpop.permute.xlu1 %315  ;;  %v1698_v44 = vpop.permute.xlu0 %1328  ;;  %v380_v11 = vsel %vm378_vm13, %v373_v3, %v304_v56  ;;  %v379_v48 = vsel %vm378_vm13, %v372_v5, %v303_v42  ;;  %v360_v12 = vsel %vm357_vm7, %v353_v58, %v203_v33  ;;  %v237_v42 = vsel %vm234_vm8, %v1301_v19, %v1306_v34 }
  0x9b   :  { %v1331_v61 = vunpack.i.h.bf16 %v1698_v44  ;;  %v1330_v63 = vunpack.i.l.bf16 %v1698_v44 }
  0x9d   :  { %v331_v6 = vsel %vm2051_vm14, %v1330_v63, %v1331_v61  ;;  %v330_v15 = vsel %vm2051_vm14, %v316_v43, %v1330_v63  ;;  %v271_v63 = vsel %vm268_vm10, %v1311_v23, %v1316_v35  ;;  %vm2054_vm14 = vcmask 744448  }
  0x9e   :  { %v1721_v17 = vpop.permute.xlu1 %1338  ;;  %v1723_v18 = vpop.permute.xlu0 %1333  ;;  %v1176_v20 = vpack.c.bf16 %v331_v6, %v380_v11  ;;  %v1179_v21 = vpack.c.bf16 %v330_v15, %v379_v48  ;;  %v305_v0 = vsel %vm2054_vm14, %v1321_v30, %v1326_v36  ;;  %v367_v30 = vsel %vm364_vm9, %v360_v12, %v237_v42 }
  0x9f   :  { %v1335_v29 = vunpack.i.l.bf16 %v1723_v18  ;;  %v1336_v60 = vunpack.i.h.bf16 %v1723_v18  ;;  %v1340_v50 = vunpack.i.l.bf16 %v1721_v17  ;;  %v1341_v16 = vunpack.i.h.bf16 %v1721_v17 }
  0xa0   :  { %1178 = vmatprep.subr.msk.bf16.mxu0 %vm1715_vm12, %v1176_v20  ;;  %1242 = vmatprep.subr.msk.bf16.mxu1 %vm1715_vm12, %v1176_v20 }
  0xa1   :  { %1181 = vmatpush1.bf16.msk.msra.mxu0 %vm1715_vm12, %v1179_v21  ;;  %1243 = vmatpush1.bf16.msk.msra.mxu1 %vm1715_vm12, %v1179_v21  ;;  %v102_v37 = vsel %vm98_vm1, %v1266_v2, %v1335_v29  ;;  %v103_v27 = vsel %vm98_vm1, %v1335_v29, %v1336_v60  ;;  %v136_v43 = vsel %vm132_vm0, %v1276_v22, %v1340_v50 }
  0xa2   :  { %v1743_v25 = vpop.permute.xlu1 %1348  ;;  %v1745_v26 = vpop.permute.xlu0 %1343  ;;  %v340_v56 = vsel %vm336_vm2, %v1492_v10, %v102_v37  ;;  %v137_v10 = vsel %vm132_vm0, %v1340_v50, %v1341_v16  ;;  %v341_v2 = vsel %vm336_vm2, %v1535_v53, %v103_v27  ;;  %v374_v53 = vsel %vm371_vm11, %v367_v30, %v271_v63 }
  0xa3   :  { %v1345_v52 = vunpack.i.l.bf16 %v1745_v26  ;;  %v1346_v39 = vunpack.i.h.bf16 %v1745_v26  ;;  %v1350_v57 = vunpack.i.l.bf16 %v1743_v25  ;;  %v1351_v13 = vunpack.i.h.bf16 %v1743_v25  ;;  %v1856_v26 = vld [vmem:[%s2045_s2 + $0x20] sm:$0xff] }
  0xa4   :  { %1144 = vmatmul.mubr.msk.f32.vlgmr.msra.gmra.mrb[0].mxu0 %vm393_vm15, %v1738_v24  ;;  %1150 = vmatmul.mubr.msk.f32.vlgmr.msra.gmra.mrb[0].mxu1 %vm393_vm15, %v1751_v55  ;;  %v347_v5 = vsel %vm343_vm4, %v340_v56, %v136_v43  ;;  %v348_v18 = vsel %vm343_vm4, %v341_v2, %v137_v10  ;;  %v381_v21 = vsel %vm378_vm13, %v374_v53, %v305_v0 }
  0xa5   :  { %500 = vmatprep.mubr.f32.mxu0 %v1430_v62  ;;  %536 = vmatprep.mubr.f32.mxu1 %v1430_v62  ;;  %v170_v59 = vsel %vm166_vm3, %v1286_v47, %v1345_v52  ;;  %v171_v3 = vsel %vm166_vm3, %v1345_v52, %v1346_v39  ;;  %v204_v15 = vsel %vm200_vm6, %v1296_v46, %v1350_v57 }
  0xa6   :  { %v1771_v31 = vpop.permute.xlu1 %1353  ;;  %v97_v8 = vpop.permute.xlu0 %96  ;;  %v354_v48 = vsel %vm350_vm5, %v347_v5, %v170_v59  ;;  %v205_v22 = vsel %vm200_vm6, %v1350_v57, %v1351_v13  ;;  %v355_v7 = vsel %vm350_vm5, %v348_v18, %v171_v3 }
  0xa7   :  { %v1355_v19 = vunpack.i.l.bf16 %v1771_v31  ;;  %v104_v47 = vsel %vm98_vm1, %v1336_v60, %v97_v8  ;;  %v1356_v46 = vunpack.i.h.bf16 %v1771_v31  ;;  %v361_v9 = vsel %vm357_vm7, %v354_v48, %v204_v15 }
  0xa8   :  { %1145 = vmatmul.mubr.msk.f32.gmra.mrb[2].mxu0 %vm393_vm15, %v1765_v51  ;;  %1151 = vmatmul.mubr.msk.f32.gmra.mrb[2].mxu1 %vm393_vm15, %v1785_v4  ;;  %v342_v50 = vsel %vm336_vm2, %v1538_v54, %v104_v47  ;;  %v390_v54 = vld [vmem:[%s2045_s2 + $0x28] sm:$0xff]  ;;  %v362_v63 = vsel %vm357_vm7, %v355_v7, %v205_v22  ;;  %vm2057_vm2 = vmmov %vm2054_vm14 }
  0xa9   :  { %506 = vmatprep.mubr.f32.mxu0 %v1430_v62  ;;  %607 = vmatprep.mubr.f32.mxu1 %v1430_v62  ;;  %v238_v20 = vsel %vm234_vm8, %v1306_v34, %v1355_v19  ;;  %v239_v44 = vsel %vm234_vm8, %v1355_v19, %v1356_v46 }
  0xaa   :  { %v1804_v40 = vpop.permute.xlu1 %1358  ;;  %v131_v41 = vpop.permute.xlu0 %130  ;;  %v368_v60 = vsel %vm364_vm9, %v361_v9, %v238_v20  ;;  %v369_v59 = vsel %vm364_vm9, %v362_v63, %v239_v44 }
  0xab   :  { %v1360_v23 = vunpack.i.l.bf16 %v1804_v40  ;;  %v138_v49 = vsel %vm132_vm0, %v1341_v16, %v131_v41  ;;  %vm2055_vm0 = vcmask 736256  }
  0xac   :  { %1146 = vmatmul.mubr.msk.f32.gmra.mrb[4].mxu0 %vm393_vm15, %v1799_v38  ;;  %vm2056_vm1 = vmmov %vm2055_vm0 }
  0xad   :  { %512 = vmatprep.mubr.f32.mxu0 %v1430_v62  ;;  %v272_v25 = vsel %vm268_vm10, %v1316_v35, %v1360_v23  ;;  %v1361_v35 = vunpack.i.h.bf16 %v1804_v40 }
  0xae   :  { %v1364_v6 = vpop.permute.xlu1 %1363  ;;  %v165_v11 = vpop.permute.xlu0 %164  ;;  %v375_v31 = vsel %vm371_vm11, %v368_v60, %v272_v25 }
  0xaf   :  { %v1365_v17 = vunpack.i.l.bf16 %v1364_v6  ;;  %v172_v8 = vsel %vm166_vm3, %v1346_v39, %v165_v11  ;;  %v1366_v12 = vunpack.i.h.bf16 %v1364_v6  ;;  %v273_v0 = vsel %vm268_vm10, %v1360_v23, %v1361_v35  ;;  %vm2058_vm3 = vmmov %vm2057_vm2 }
  0xb0   :  { %1147 = vmatmul.mubr.msk.f32.gmra.mrb[6].mxu0 %vm393_vm15, %v1835_v28  ;;  %v376_v6 = vsel %vm371_vm11, %v369_v59, %v273_v0 }
  0xb1   :  { %518 = vmatprep.mubr.f32.mxu0 %v1430_v62  ;;  %v306_v29 = vsel %vm2054_vm14, %v1326_v36, %v1365_v17  ;;  %v349_v36 = vsel %vm343_vm4, %v342_v50, %v138_v49  ;;  %v307_v19 = vsel %vm2057_vm2, %v1365_v17, %v1366_v12  ;;  %vm2059_vm4 = vmmov %vm2055_vm0 }
  0xb2   :  { %v1369_v45 = vpop.permute.xlu1 %1368  ;;  %v199_v32 = vpop.permute.xlu0 %198  ;;  %v382_v16 = vsel %vm378_vm13, %v375_v31, %v306_v29  ;;  %v356_v27 = vsel %vm350_vm5, %v349_v36, %v172_v8  ;;  %v383_v53 = vsel %vm378_vm13, %v376_v6, %v307_v19  ;;  %vm2060_vm5 = vmmov %vm2055_vm0 }
  0xb3   :  { %v1371_v33 = vunpack.i.h.bf16 %v1369_v45  ;;  %v1370_v34 = vunpack.i.l.bf16 %v1369_v45  ;;  %v206_v37 = vsel %vm200_vm6, %v1351_v13, %v199_v32  ;;  %vm872_vm6 = vcmask 523264  }
  0xb4   :  { %1148 = vmatmul.mubr.msk.f32.gmra.mrb[8].mxu0 %vm393_vm15, %v1856_v26 }
  0xb5   :  { %v332_v52 = vsel %vm2055_vm0, %v1331_v61, %v1370_v34  ;;  %v333_v58 = vsel %vm2056_vm1, %v1370_v34, %v1371_v33  ;;  %524 = vmatprep.mubr.f32.mxu0 %v1430_v62  ;;  %v363_v61 = vsel %vm357_vm7, %v356_v27, %v206_v37 }
  0xb6   :  { %v1182_v39 = vpack.c.bf16 %v333_v58, %v382_v16  ;;  %v1185_v40 = vpack.c.bf16 %v332_v52, %v381_v21  ;;  %v267_v41 = vpop.permute.xlu1 %266  ;;  %v233_v42 = vpop.permute.xlu0 %232 }
  0xb7   :  { %v240_v43 = vsel %vm234_vm8, %v1356_v46, %v233_v42  ;;  %v274_v56 = vsel %vm268_vm10, %v1361_v35, %v267_v41 }
  0xb8   :  { %v370_v57 = vsel %vm364_vm9, %v363_v61, %v240_v43  ;;  %1149 = vmatmul.mubr.msk.f32.gmra.mrb[10].mxu0 %vm393_vm15, %v390_v54  ;;  %1184 = vmatprep.subr.msk.bf16.mxu1 %vm1715_vm12, %v1182_v39 }
  0xb9   :  { %1187 = vmatpush1.bf16.msk.msra.mxu1 %vm1715_vm12, %v1185_v40  ;;  %720 = vmatprep.mubr.f32.mxu0 %v1430_v62  ;;  %v377_v5 = vsel %vm371_vm11, %v370_v57, %v274_v56 }
  0xba   :  { %v1374_v10 = vpop.permute.xlu1 %1373  ;;  %v301_v2 = vpop.permute.xlu0 %300 }
  0xbb   :  { %v1376_v13 = vunpack.i.h.bf16 %v1374_v10  ;;  %v1375_v30 = vunpack.i.l.bf16 %v1374_v10  ;;  %v308_v3 = vsel %vm2058_vm3, %v1366_v12, %v301_v2 }
  0xbc   :  { %v384_v23 = vsel %vm378_vm13, %v377_v5, %v308_v3  ;;  %1154 = vmatmul.mubr.msk.f32.vlgmr.msra.gmra.mrb[4].mxu1 %vm393_vm15, %v1738_v24 }
  0xbd   :  { %v334_v11 = vsel %vm2059_vm4, %v1371_v33, %v1375_v30  ;;  %v335_v15 = vsel %vm2060_vm5, %v1375_v30, %v1376_v13  ;;  %613 = vmatprep.mubr.f32.mxu1 %v1430_v62 }
  0xbe   :  { %v1191_v48 = vpack.c.bf16 %v334_v11, %v383_v53  ;;  %v1188_v17 = vpack.c.bf16 %v335_v15, %v384_v23 }
  0xc0   :  { %1155 = vmatmul.mubr.msk.f32.gmra.mrb[6].mxu1 %vm393_vm15, %v1765_v51  ;;  %1190 = vmatprep.subr.msk.bf16.mxu0 %vm1715_vm12, %v1188_v17  ;;  %v1993_v17 = vld [vmem:[%s2047_s4] sm:$0x3]  ;;  %s1435_s4 = smov [#allocation2]  }
  0xc1   :  { %1193 = vmatpush1.bf16.msk.msra.mxu0 %vm1715_vm12, %v1191_v48  ;;  %619 = vmatprep.mubr.f32.mxu1 %v1430_v62  ;;  %s1130_s14 = sshll.u32 %s1435_s4, 4  ;;  %s1131_s14 = int_to_ptr.vmem [resolvable:$true] %s1130_s14 }
  0xc2   :  { %s1399_s15 = scalar_lea.vmem %s1131_s14, 192  ;;  %p1404_p1 = scmp.lt.s32.totalorder %s1131_s14, %s1131_s14 }
  0xc3   :  { %p1400_p0 = scmp.ne.s32.totalorder %s1131_s14, %s1399_s15  ;;  %p1405_p2 = scmp.lt.s32.totalorder %s1399_s15, %s1399_s15 }
  0xc4   :  { %1156 = vmatmul.mubr.msk.f32.gmra.mrb[8].mxu1 %vm393_vm15, %v1799_v38  ;;  %1164 = vmatmul.mubr.msk.f32.vlgmr.msra.gmra.mrb[12].mxu0 %vm393_vm15, %v1738_v24 }
  0xc5   :  { %625 = vmatprep.mubr.f32.mxu1 %v1430_v62  ;;  %726 = vmatprep.mubr.f32.mxu0 %v1430_v62  ;;  %p1406_p3 = por %p1405_p2, %p1404_p1 }
  0xc7   :  { %p1407_p4 = pnand %p1406_p3, %p1400_p0 }
  0xc8   :  { %1157 = vmatmul.mubr.msk.f32.gmra.mrb[10].mxu1 %vm393_vm15, %v1835_v28  ;;  %1165 = vmatmul.mubr.msk.f32.gmra.mrb[14].mxu0 %vm393_vm15, %v1765_v51 }
  0xc9   :  { %631 = vmatprep.mubr.f32.mxu1 %v1430_v62  ;;  %732 = vmatprep.mubr.f32.mxu0 %v1430_v62 }
  0xcb   :  { %v1380_v14 = vpop.permute.xlu0 %1379  ;;  %v1386_v25 = vpop.permute.xlu1 %1385 }
  0xcc   :  { %1158 = vmatmul.mubr.msk.f32.gmra.mrb[12].mxu1 %vm393_vm15, %v1856_v26  ;;  %1166 = vmatmul.mubr.msk.f32.gmra.mrb[16].mxu0 %vm393_vm15, %v1799_v38  ;;  %v1954_v51 = vunpack.i.l.bf16 %v1380_v14  ;;  %v1968_v60 = vunpack.i.l.bf16 %v1386_v25  ;;  %v1972_v31 = vunpack.i.h.bf16 %v1386_v25 }
  0xcd   :  { %637 = vmatprep.mubr.f32.mxu1 %v1430_v62  ;;  %738 = vmatprep.mubr.f32.mxu0 %v1430_v62 }
  0xcf   :  { %v1396_v24 = vpop.permute.xlu0 %1395  ;;  %v1391_v12 = vpop.permute.xlu1 %1390 }
  0xd0   :  { %1159 = vmatmul.mubr.msk.f32.gmra.mrb[14].mxu1 %vm393_vm15, %v390_v54  ;;  %1167 = vmatmul.mubr.msk.f32.gmra.mrb[18].mxu0 %vm393_vm15, %v1835_v28  ;;  %v1956_v28 = vunpack.i.h.bf16 %v1380_v14  ;;  %v1958_v20 = vunpack.i.l.bf16 %v1396_v24  ;;  %v1961_v22 = vunpack.i.h.bf16 %v1396_v24  ;;  %v1978_v42 = vunpack.i.l.bf16 %v1391_v12 }
  0xd1   :  { %643 = vmatprep.mubr.f32.mxu1 %v1430_v62  ;;  %744 = vmatprep.mubr.f32.mxu0 %v1430_v62  ;;  %v1980_v43 = vunpack.i.h.bf16 %v1391_v12 }
  0xd4   :  { %1160 = vmatmul.mubr.msk.f32.gmra.mrb[16].mxu1 %vm393_vm15, %v1751_v55  ;;  %1168 = vmatmul.mubr.msk.f32.gmra.mrb[20].mxu0 %vm393_vm15, %v1856_v26 }
  0xd5   :  { %649 = vmatprep.mubr.f32.mxu1 %v1430_v62  ;;  %750 = vmatprep.mubr.f32.mxu0 %v1430_v62 }
  0xd8   :  { %1161 = vmatmul.mubr.msk.f32.gmra.mrb[18].mxu1 %vm393_vm15, %v1785_v4  ;;  %1169 = vmatmul.mubr.msk.f32.gmra.mrb[22].mxu0 %vm393_vm15, %v390_v54 }
  0xd9   :  { %756 = vmatprep.mubr.f32.mxu0 %v1430_v62  ;;  %940 = vmatprep.mubr.f32.mxu1 %v1430_v62 }
  0xdc   :  { %1170 = vmatmul.mubr.msk.f32.gmra.mrb[24].mxu0 %vm393_vm15, %v1751_v55 }
  0xdd   :  { %762 = vmatprep.mubr.f32.mxu0 %v1430_v62 }
  0xe0   :  { %1171 = vmatmul.mubr.msk.f32.gmra.mrb[26].mxu0 %vm393_vm15, %v1785_v4 }
  0xe1   :  { %1082 = vmatprep.mubr.f32.mxu0 %v1430_v62 }
 0x177   :  { %v496_v38 = vpop.f32.mrb[0].mxu0  ;;  %v532_v21 = vpop.f32.mrb[0].mxu1 }
 0x178   :  { %v498_v18 = vpop.f32.mrb[1].mxu0  ;;  %v817_v55 = vmax.f32 %v496_v38, %v1954_v51  ;;  %v534_v7 = vpop.f32.mrb[1].mxu1  ;;  %v853_v9 = vmax.f32 %v532_v21, %v1958_v20 }
 0x179   :  { %v818_v4 = vmax.f32 %v498_v18, %v1954_v51  ;;  %v854_v29 = vmax.f32 %v534_v7, %v1958_v20 }
 0x17b   :  { %v502_v47 = vpop.f32.mrb[2].mxu0  ;;  %v538_v45 = vpop.f32.mrb[2].mxu1 }
 0x17c   :  { %v823_v26 = vmax.f32 %v502_v47, %v1956_v28  ;;  %v504_v46 = vpop.f32.mrb[3].mxu0  ;;  %v859_v8 = vmax.f32 %v538_v45, %v1961_v22  ;;  %v540_v33 = vpop.f32.mrb[3].mxu1 }
 0x17d   :  { %v824_v49 = vmax.f32 %v504_v46, %v1956_v28  ;;  %v860_v35 = vmax.f32 %v540_v33, %v1961_v22 }
 0x17e   :  { %v1196_v32 = vpack.c.bf16 %v823_v26, %v817_v55  ;;  %v1208_v36 = vpack.c.bf16 %v859_v8, %v853_v9 }
 0x17f   :  { %v1194_v34 = vpack.c.bf16 %v824_v49, %v818_v4  ;;  %v508_v50 = vpop.f32.mrb[4].mxu0  ;;  %v1206_v52 = vpack.c.bf16 %v860_v35, %v854_v29 }
 0x180   :  { %v510_v37 = vpop.f32.mrb[5].mxu0  ;;  %v829_v58 = vmax.f32 %v508_v50, %v1968_v60 }
 0x181   :  { %1195 = vmatprep.subr.bf16.mxu1 %v1194_v34  ;;  %v830_v16 = vmax.f32 %v510_v37, %v1968_v60 }
 0x182   :  { %1197 = vmatpush1.bf16.msra.mxu1 %v1196_v32 }
 0x183   :  { %v514_v54 = vpop.f32.mrb[6].mxu0 }
 0x184   :  { %v835_v27 = vmax.f32 %v514_v54, %v1972_v31  ;;  %v516_v39 = vpop.f32.mrb[7].mxu0 }
 0x185   :  { %v836_v40 = vmax.f32 %v516_v39, %v1972_v31 }
 0x186   :  { %v1200_v41 = vpack.c.bf16 %v835_v27, %v829_v58 }
 0x187   :  { %v1198_v44 = vpack.c.bf16 %v836_v40, %v830_v16  ;;  %v520_v61 = vpop.f32.mrb[8].mxu0 }
 0x188   :  { %v522_v56 = vpop.f32.mrb[9].mxu0  ;;  %v841_v57 = vmax.f32 %v520_v61, %v1978_v42 }
 0x189   :  { %1199 = vmatprep.subr.bf16.mxu1 %v1198_v44  ;;  %v842_v63 = vmax.f32 %v522_v56, %v1978_v42 }
 0x18a   :  { %1201 = vmatpush1.bf16.msra.mxu1 %v1200_v41 }
 0x18b   :  { %v526_v0 = vpop.f32.mrb[10].mxu0 }
 0x18c   :  { %v847_v59 = vmax.f32 %v526_v0, %v1980_v43  ;;  %v528_v19 = vpop.f32.mrb[11].mxu0 }
 0x18d   :  { %v848_v10 = vmax.f32 %v528_v19, %v1980_v43 }
 0x18e   :  { %v1204_v2 = vpack.c.bf16 %v847_v59, %v841_v57 }
 0x18f   :  { %v1202_v13 = vpack.c.bf16 %v848_v10, %v842_v63  ;;  %v609_v30 = vpop.f32.mrb[4].mxu1 }
 0x190   :  { %v611_v3 = vpop.f32.mrb[5].mxu1  ;;  %v819_v5 = vmax.f32 %v609_v30, %v1954_v51 }
 0x191   :  { %1203 = vmatprep.subr.bf16.mxu1 %v1202_v13  ;;  %v820_v6 = vmax.f32 %v611_v3, %v1954_v51 }
 0x192   :  { %1205 = vmatpush1.bf16.msra.mxu1 %v1204_v2 }
 0x193   :  { %1207 = vmatprep.subr.bf16.mxu1 %v1206_v52  ;;  %v615_v23 = vpop.f32.mrb[6].mxu1 }
 0x194   :  { %v825_v11 = vmax.f32 %v615_v23, %v1956_v28  ;;  %v617_v53 = vpop.f32.mrb[7].mxu1 }
 0x195   :  { %v826_v15 = vmax.f32 %v617_v53, %v1956_v28 }
 0x196   :  { %1209 = vmatpush1.bf16.msra.mxu1 %v1208_v36  ;;  %v1212_v48 = vpack.c.bf16 %v825_v11, %v819_v5 }
 0x197   :  { %v1210_v14 = vpack.c.bf16 %v826_v15, %v820_v6  ;;  %v722_v24 = vpop.f32.mrb[12].mxu0  ;;  %v621_v38 = vpop.f32.mrb[8].mxu1 }
 0x198   :  { %v724_v18 = vpop.f32.mrb[13].mxu0  ;;  %v623_v21 = vpop.f32.mrb[9].mxu1  ;;  %v821_v4 = vmax.f32 %v722_v24, %v1954_v51  ;;  %v831_v25 = vmax.f32 %v621_v38, %v1968_v60 }
 0x199   :  { %1172 = vmatmul.mubr.msk.f32.vlgmr.msra.gmra.mrb[20].mxu1 %vm872_vm6, %v1993_v17  ;;  %1211 = vmatprep.subr.bf16.mxu1 %v1210_v14  ;;  %v822_v49 = vmax.f32 %v724_v18, %v1954_v51  ;;  %v832_v45 = vmax.f32 %v623_v21, %v1968_v60 }
 0x19a   :  { %1213 = vmatpush1.bf16.msra.mxu1 %v1212_v48  ;;  %1011 = vmatprep.mubr.f32.mxu1 %v1430_v62 }
 0x19b   :  { %v728_v55 = vpop.f32.mrb[14].mxu0  ;;  %v627_v7 = vpop.f32.mrb[10].mxu1 }
 0x19c   :  { %v827_v47 = vmax.f32 %v728_v55, %v1956_v28  ;;  %v730_v26 = vpop.f32.mrb[15].mxu0  ;;  %v837_v46 = vmax.f32 %v627_v7, %v1972_v31  ;;  %v629_v9 = vpop.f32.mrb[11].mxu1 }
 0x19d   :  { %v828_v29 = vmax.f32 %v730_v26, %v1956_v28  ;;  %v838_v62 = vmax.f32 %v629_v9, %v1972_v31 }
 0x19e   :  { %v1228_v32 = vpack.c.bf16 %v827_v47, %v821_v4  ;;  %v1216_v8 = vpack.c.bf16 %v837_v46, %v831_v25  ;;  %v870_v46 = vpop.permute.xlu1 %869 }
 0x19f   :  { %v1226_v33 = vpack.c.bf16 %v828_v29, %v822_v49  ;;  %v1214_v34 = vpack.c.bf16 %v838_v62, %v832_v45  ;;  %v633_v50 = vpop.f32.mrb[12].mxu1  ;;  %v734_v35 = vpop.f32.mrb[16].mxu0 }
 0x1a0   :  { %v635_v37 = vpop.f32.mrb[13].mxu1  ;;  %v736_v36 = vpop.f32.mrb[17].mxu0  ;;  %v843_v28 = vmax.f32 %v633_v50, %v1978_v42  ;;  %v833_v58 = vmax.f32 %v734_v35, %v1968_v60 }
 0x1a1   :  { %1227 = vmatprep.subr.bf16.mxu0 %v1226_v33  ;;  %1215 = vmatprep.subr.bf16.mxu1 %v1214_v34  ;;  %v844_v39 = vmax.f32 %v635_v37, %v1978_v42  ;;  %v834_v40 = vmax.f32 %v736_v36, %v1968_v60 }
 0x1a2   :  { %1229 = vmatpush1.bf16.msra.mxu0 %v1228_v32  ;;  %1217 = vmatpush1.bf16.msra.mxu1 %v1216_v8  ;;  %v1434_v32 = vmov 1983009808  }
 0x1a3   :  { %v639_v52 = vpop.f32.mrb[14].mxu1  ;;  %v740_v51 = vpop.f32.mrb[18].mxu0 }
 0x1a4   :  { %v849_v16 = vmax.f32 %v639_v52, %v1980_v43  ;;  %v839_v54 = vmax.f32 %v740_v51, %v1972_v31  ;;  %v641_v12 = vpop.f32.mrb[15].mxu1  ;;  %v742_v27 = vpop.f32.mrb[19].mxu0 }
 0x1a5   :  { %v850_v41 = vmax.f32 %v641_v12, %v1980_v43  ;;  %v840_v44 = vmax.f32 %v742_v27, %v1972_v31 }
 0x1a6   :  { %v1220_v61 = vpack.c.bf16 %v849_v16, %v843_v28  ;;  %v1232_v56 = vpack.c.bf16 %v839_v54, %v833_v58 }
 0x1a7   :  { %v1218_v57 = vpack.c.bf16 %v850_v41, %v844_v39  ;;  %v1230_v63 = vpack.c.bf16 %v840_v44, %v834_v40  ;;  %v645_v0 = vpop.f32.mrb[16].mxu1  ;;  %v746_v59 = vpop.f32.mrb[20].mxu0 }
 0x1a8   :  { %v647_v19 = vpop.f32.mrb[17].mxu1  ;;  %v748_v10 = vpop.f32.mrb[21].mxu0  ;;  %v855_v60 = vmax.f32 %v645_v0, %v1958_v20  ;;  %v845_v30 = vmax.f32 %v746_v59, %v1978_v42 }
 0x1a9   :  { %1219 = vmatprep.subr.bf16.mxu1 %v1218_v57  ;;  %1231 = vmatprep.subr.bf16.mxu0 %v1230_v63  ;;  %v856_v23 = vmax.f32 %v647_v19, %v1958_v20  ;;  %v846_v11 = vmax.f32 %v748_v10, %v1978_v42 }
 0x1aa   :  { %1221 = vmatpush1.bf16.msra.mxu1 %v1220_v61  ;;  %1233 = vmatpush1.bf16.msra.mxu0 %v1232_v56 }
 0x1ab   :  { %v651_v2 = vpop.f32.mrb[18].mxu1  ;;  %v752_v13 = vpop.f32.mrb[22].mxu0 }
 0x1ac   :  { %v861_v31 = vmax.f32 %v651_v2, %v1961_v22  ;;  %v851_v3 = vmax.f32 %v752_v13, %v1980_v43  ;;  %v653_v5 = vpop.f32.mrb[19].mxu1  ;;  %v754_v6 = vpop.f32.mrb[23].mxu0 }
 0x1ad   :  { %v862_v53 = vmax.f32 %v653_v5, %v1961_v22  ;;  %v852_v15 = vmax.f32 %v754_v6, %v1980_v43 }
 0x1ae   :  { %v1224_v48 = vpack.c.bf16 %v861_v31, %v855_v60  ;;  %v1236_v14 = vpack.c.bf16 %v851_v3, %v845_v30 }
 0x1af   :  { %v1222_v24 = vpack.c.bf16 %v862_v53, %v856_v23  ;;  %v1234_v38 = vpack.c.bf16 %v852_v15, %v846_v11  ;;  %v758_v18 = vpop.f32.mrb[24].mxu0 }
 0x1b0   :  { %v760_v21 = vpop.f32.mrb[25].mxu0  ;;  %v857_v7 = vmax.f32 %v758_v18, %v1958_v20 }
 0x1b1   :  { %1223 = vmatprep.subr.bf16.mxu1 %v1222_v24  ;;  %1235 = vmatprep.subr.bf16.mxu0 %v1234_v38  ;;  %v858_v47 = vmax.f32 %v760_v21, %v1958_v20  ;;  %v1098_v20 = vunpack.c.l.s4 %v1434_v32 }
 0x1b2   :  { %1225 = vmatpush1.bf16.msra.mxu1 %v1224_v48  ;;  %1237 = vmatpush1.bf16.msra.mxu0 %v1236_v14 }
 0x1b3   :  { %v764_v55 = vpop.f32.mrb[26].mxu0  ;;  %v1099_v8 = vunpack.c.0.s8 %v1098_v20 }
 0x1b4   :  { %v863_v4 = vmax.f32 %v764_v55, %v1961_v22  ;;  %v766_v42 = vpop.f32.mrb[27].mxu0 }
 0x1b5   :  { %v864_v43 = vmax.f32 %v766_v42, %v1961_v22  ;;  %1173 = vmatmul.mubr.msk.f32.vlgmr.msra.gmra.mrb[22].mxu1 %vm872_vm6, %v1993_v17  ;;  %v1102_v50 = vsub.s32 %v1099_v8, %v1471_v1 }
 0x1b6   :  { %v1240_v25 = vpack.c.bf16 %v863_v4, %v857_v7 }
 0x1b7   :  { %v1238_v26 = vpack.c.bf16 %v864_v43, %v858_v47 }
 0x1b9   :  { %1239 = vmatprep.subr.bf16.mxu0 %v1238_v26 }
 0x1ba   :  { %1241 = vmatpush1.bf16.msra.mxu0 %v1240_v25 }
 0x1bd   :  { %1174 = vmatmul.mubr.msk.f32.vlgmr.msra.gmra.mrb[28].mxu0 %vm872_vm6, %v1993_v17 }
 0x26c   :  { %v942_v9 = vpop.f32.mrb[20].mxu1 }
 0x26d   :  { %v943_v49 = vadd.f32 %v942_v9, %v870_v46  ;;  %v944_v29 = vpop.f32.mrb[21].mxu1 }
 0x26e   :  { %v945_v45 = vadd.f32 %v944_v29, %v870_v46 }
 0x270   :  { %v1095_v62 = vcombine.low %v943_v49, %v945_v45 }
 0x272   :  { %v1103_v36 = vrot.slane %v1095_v62, %v1102_v50 }
 0x288   :  { %v1013_v22 = vpop.f32.mrb[22].mxu1 }
 0x289   :  { %v1014_v33 = vadd.f32 %v1013_v22, %v870_v46  ;;  %v1015_v34 = vpop.f32.mrb[23].mxu1 }
 0x28a   :  { %v1016_v35 = vadd.f32 %v1015_v34, %v870_v46 }
 0x28c   :  { %v1096_v37 = vcombine.low %v1014_v33, %v1016_v35 }
 0x28e   :  { %v1110_v52 = vrot.slane %v1096_v37, %v1102_v50 }
 0x290   :  { %v1084_v51 = vpop.f32.mrb[28].mxu0  ;;  %v1111_v17 = vcombine.low %v1103_v36, %v1110_v52 }
 0x291   :  { %v1085_v28 = vadd.f32 %v1084_v51, %v870_v46  ;;  %v1086_v58 = vpop.f32.mrb[29].mxu0 }
 0x292   :  { %v1087_v16 = vadd.f32 %v1086_v58, %v870_v46  ;;  %1122 = vst [vmem:[#allocation2] sm:$0xff] %v1111_v17 }
 0x294   :  { %v1112_v54 = vcombine.low %v1085_v28, %v1087_v16 }
 0x296   :  { %1175 = vst.sshfl [vmem:[#allocation2 + $0x8] sm:$0x33 pattern:$0x76325410] %v1112_v54 }
 0x297   :  { %1410 = shalt.err (!%p1407_p4)
}
 0x298   :  { %s1411_s18 = scalar_lea.hbm %s2049_s6, 192 }
 0x299   :  { %p1412_p5 = scmp.ne.s32.totalorder %s2049_s6, %s1411_s18  ;;  %p1415_p6 = scmp.lt.u32.totalorder %s1411_s18, %s2049_s6 }
 0x29b   :  { %p1417_p7 = pnand %p1415_p6, %p1412_p5 }
 0x29d   :  { %1420 = shalt.err (!%p1417_p7)
}
 0x29e   :  { %1133 = dma.vmem_to_hbm [thread:$0]  %s1131_s14, 192, %s2049_s6, [#allocation3]  }
 0x29f   :  { %1421 = dma.done.wait [#allocation3], 192  }
 0x2a0   :  { %1422 = vsyncadd [#allocation3], 4294967104 }
 0x2a1   :  { %1137 = vsyncpa [#allocation3], 1 }

</bundles_post_ra>
